<compile_context>
chip_gen: v7x
topology: tpu7x:2x2x1
jax: 0.10.0
libtpu: 0.0.40
codegen_flags: <defaults>
</compile_context>

<pallas_src>
import jax
import jax.numpy as jnp
from jax.experimental import pallas as pl
from jax.experimental.pallas import tpu as pltpu


_LANE = 128
_MAX_TILE_BYTES = 4 * 1024 * 1024      # per-array, per-block VMEM budget
_MIN_SPLIT_BYTES = 2 * 1024 * 1024     # above this, force >= 4 grid blocks (v7x 2 TCs)
_VMEM_LIMIT_BYTES = 32 * 1024 * 1024   # explicit scoped-VMEM limit (safe on v5e/v6e/v7x)


def _minus_one_kernel(x_ref, o_ref):
    # out = x - 1 as a scalar-immediate VPU subtract.
    x = x_ref[...]
    o_ref[...] = x - jnp.asarray(1, dtype=x.dtype)


def _sublanes(itemsize: int) -> int:
    # Packed sublanes per vreg: 8 for 32-bit, 16 for 16-bit, 32 for 8-bit dtypes.
    return max(8, 32 // max(itemsize, 1))


def _round_up(v: int, m: int) -> int:
    return ((v + m - 1) // m) * m


def _pick_cols(n: int, sublanes: int):
    """Widest lane-dense column count that divides n and keeps rows >= sublanes."""
    if n % _LANE != 0:
        return None
    for c in (2048, 1024, 512, 256, 128):
        if n % c == 0 and n // c >= sublanes:
            return c
    return _LANE  # tiny array: maximize row count (sublane density)


def _target_num_blocks(total_bytes: int) -> int:
    """Grid-block count: respect the VMEM tile budget; keep both v7x TCs fed."""
    blocks = max(1, pl.cdiv(total_bytes, _MAX_TILE_BYTES))
    if total_bytes >= _MIN_SPLIT_BYTES:
        blocks = max(blocks, 4)      # >= 2 tiles per TensorCore on v7x
    if blocks > 1 and blocks % 2:
        blocks += 1                  # balanced split across 2 TensorCores
    return blocks


def minus(x: jax.Array, *, donate: bool = False) -> jax.Array:
    """x - ones_like(x), computed in a tiled, pipelined Pallas TPU kernel."""
    orig_shape = x.shape
    dtype = x.dtype
    n = x.size
    if n == 0:
        return x

    itemsize = jnp.dtype(dtype).itemsize
    sub = _sublanes(itemsize)
    total_bytes = n * itemsize
    blocks = _target_num_blocks(total_bytes)

    cost = pl.CostEstimate(flops=n, transcendentals=0,
                           bytes_accessed=2 * total_bytes)
    cparams = pltpu.CompilerParams(
        dimension_semantics=("parallel",),       # shard row blocks across v7x TCs
        vmem_limit_bytes=_VMEM_LIMIT_BYTES,
    )
    aliases = {0: 0} if donate else {}

    cols = _pick_cols(n, sub)
    if cols is not None:
        # --- Main path: lane-dense 2D slab, row-tiled ----------------------
        rows = n // cols
        x2d = x.reshape(rows, cols)
        block_rows = min(rows, _round_up(pl.cdiv(rows, blocks), sub))
        grid = (pl.cdiv(rows, block_rows),)      # edge block (if any) masked by Pallas
        out = pl.pallas_call(
            _minus_one_kernel,
            out_shape=jax.ShapeDtypeStruct((rows, cols), dtype),
            grid=grid,
            in_specs=[pl.BlockSpec((block_rows, cols), lambda i: (i, 0))],
            out_specs=pl.BlockSpec((block_rows, cols), lambda i: (i, 0)),
            compiler_params=cparams,
            cost_estimate=cost,
            input_output_aliases=aliases,
        )(x2d)
        return out.reshape(orig_shape)

    # --- Fallback: n not a multiple of 128 --------------------------------
    # 1D grid over the flat array; the partial edge block is masked by Pallas
    # (no jnp.pad + slice-back HBM round-trips).
    flat = x.reshape(-1)
    block_elems = _round_up(pl.cdiv(n, blocks), sub * _LANE)
    if block_elems >= n:
        block_elems = n                          # full-extent block is always legal
    grid = (pl.cdiv(n, block_elems),)
    out = pl.pallas_call(
        _minus_one_kernel,
        out_shape=jax.ShapeDtypeStruct((n,), dtype),
        grid=grid,
        in_specs=[pl.BlockSpec((block_elems,), lambda i: (i,))],
        out_specs=pl.BlockSpec((block_elems,), lambda i: (i,)),
        compiler_params=cparams,
        cost_estimate=cost,
        input_output_aliases=aliases,
    )(flat)
    return out.reshape(orig_shape)


if __name__ == "__main__":
    key = jax.random.PRNGKey(0)
    # Small NCHW input consistent with the PyTorch module's generic tensor.
    x = jax.random.normal(key, (2, 4, 16, 16), dtype=jnp.float32)

    y = minus(x)
    jax.block_until_ready(y)

    # Reference check against plain JAX.
    ref = x - jnp.ones_like(x)
    assert y.shape == x.shape and y.dtype == x.dtype
    assert jnp.allclose(y, ref), "mismatch vs reference"

    print("KERNEL_OK")
</pallas_src>

<mosaic_0001>
module attributes {stable_mosaic.version = 11 : i64} {
  func.func @_minus_one_kernel(%arg0: i32, %arg1: memref<8x256xf32, #tpu.memory_space<vmem>>, %arg2: memref<8x256xf32, #tpu.memory_space<vmem>>) attributes {dimension_semantics = [#tpu.dimension_semantics<parallel>], iteration_bounds = array<i64: 1>, scalar_prefetch = 0 : i64, scratch_operands = 0 : i64, tpu.core_type = #tpu.core_type<tc>, window_params = [{transform_indices = @transform_0, window_bounds = array<i64: 8, 256>}, {transform_indices = @transform_1, window_bounds = array<i64: 8, 256>}]} {
    %c0 = arith.constant 0 : index
    %c0_0 = arith.constant 0 : index
    %0 = vector.load %arg1[%c0, %c0_0] : memref<8x256xf32, #tpu.memory_space<vmem>>, vector<8x256xf32>
    %cst = arith.constant 1.000000e+00 : f32
    %1 = vector.broadcast %cst : f32 to vector<8x256xf32>
    %2 = arith.subf %0, %1 : vector<8x256xf32>
    %c0_1 = arith.constant 0 : index
    %c0_2 = arith.constant 0 : index
    %3 = vector.load %arg2[%c0_1, %c0_2] : memref<8x256xf32, #tpu.memory_space<vmem>>, vector<8x256xf32>
    tpu.vector_store %arg2[%c0_1, %c0_2], %2 {strides = array<i32>} : memref<8x256xf32, #tpu.memory_space<vmem>>, vector<8x256xf32>,
    return
  }
  func.func @transform_0(%arg0: i32) -> (i32, i32) {
    %c0_i32 = arith.constant 0 : i32
    %c0_i32_0 = arith.constant 0 : i32
    return %arg0, %c0_i32 : i32, i32
  }
  func.func @transform_1(%arg0: i32) -> (i32, i32) {
    %c0_i32 = arith.constant 0 : i32
    %c0_i32_0 = arith.constant 0 : i32
    return %arg0, %c0_i32 : i32, i32
  }
}

</mosaic_0001>

<bundles_post_ra>
// kernel: tpu_custom_call.1
= control target key start
LH: loop header
LB: loop body
LE: loop exit
PB: predicated region body
PF: predicated region fallthrough
CT: control target
= control target key end

     0   :  { %6 = vsyncpa [#allocation3], 0  ;;  %s130_s0 = inlined_call_operand.hbm [shape: f32[8,256], index: 0, kind: input, shape index: {}]   ;;  %s131_s1 = inlined_call_operand.hbm [shape: f32[8,256], index: 1, kind: output, shape index: {}]  }
   0x1   :  { %7 = vsyncpa [#allocation4], 0  ;;  %s94_s6 = smov [#allocation2]   ;;  %s46_s10 = scalar_lea.hbm %s130_s0, 256 }
   0x2   :  { %s14_s7 = sshll.u32 %s94_s6, 4  ;;  %p47_p0 = scmp.ne.s32.totalorder %s130_s0, %s46_s10  ;;  %s15_s7 = int_to_ptr.vmem [resolvable:$true] %s14_s7 }
   0x3   :  { %p50_p1 = scmp.lt.u32.totalorder %s46_s10, %s130_s0 }
   0x5   :  { %p52_p2 = pnand %p50_p1, %p47_p0 }
   0x7   :  { %55 = shalt.err (!%p52_p2)
}
   0x8   :  { %s56_s15 = scalar_lea.vmem %s15_s7, 256  ;;  %p61_p4 = scmp.lt.s32.totalorder %s15_s7, %s15_s7 }
   0x9   :  { %p57_p3 = scmp.ne.s32.totalorder %s15_s7, %s56_s15  ;;  %p62_p5 = scmp.lt.s32.totalorder %s56_s15, %s56_s15 }
   0xb   :  { %p63_p6 = por %p62_p5, %p61_p4 }
   0xd   :  { %p64_p7 = pnand %p63_p6, %p57_p3 }
   0xf   :  { %67 = shalt.err (!%p64_p7)
}
  0x10   :  { %17 = dma.hbm_to_vmem [thread:$0]  %s130_s0, 256, %s15_s7, [#allocation3]  }
  0x11   :  { %90 = dma.done.wait [#allocation3], 256  }
  0x12   :  { %91 = vsyncadd [#allocation3], 4294967040  ;;  %s95_s18 = smov [#allocation5]   ;;  %v21_v0 = vld [vmem:[#allocation2] sm:$0xff]  ;;  %v22_v1 = vld [vmem:[#allocation2 + $0x8] sm:$0xff] }
  0x13   :  { %s33_s19 = sshll.u32 %s95_s18, 4  ;;  %v42_v2 = vadd.f32 -1.0, %v21_v0  ;;  %v43_v3 = vadd.f32 -1.0, %v22_v1  ;;  %s34_s19 = int_to_ptr.vmem [resolvable:$true] %s33_s19 }
  0x14   :  { %s68_s20 = scalar_lea.vmem %s34_s19, 256  ;;  %p73_p9 = scmp.lt.s32.totalorder %s34_s19, %s34_s19 }
  0x15   :  { %25 = vst [vmem:[#allocation5] sm:$0xff] %v42_v2  ;;  %26 = vst [vmem:[#allocation5 + $0x8] sm:$0xff] %v43_v3  ;;  %p69_p8 = scmp.ne.s32.totalorder %s34_s19, %s68_s20  ;;  %p74_p10 = scmp.lt.s32.totalorder %s68_s20, %s68_s20 }
  0x17   :  { %p75_p11 = por %p74_p10, %p73_p9 }
  0x19   :  { %p76_p12 = pnand %p75_p11, %p69_p8 }
  0x1b   :  { %79 = shalt.err (!%p76_p12)
}
  0x1c   :  { %s80_s22 = scalar_lea.hbm %s131_s1, 256 }
  0x1d   :  { %p81_p13 = scmp.ne.s32.totalorder %s131_s1, %s80_s22  ;;  %p84_p0 = scmp.lt.u32.totalorder %s80_s22, %s131_s1 }
  0x1f   :  { %p86_p1 = pnand %p84_p0, %p81_p13 }
  0x21   :  { %89 = shalt.err (!%p86_p1)
}
  0x22   :  { %36 = dma.vmem_to_hbm [thread:$0]  %s34_s19, 256, %s131_s1, [#allocation4]  }
  0x23   :  { %92 = dma.done.wait [#allocation4], 256  }
  0x24   :  { %93 = vsyncadd [#allocation4], 4294967040 }
  0x25   :  { %40 = vsyncpa [#allocation3], 1 }
  0x26   :  { %41 = vsyncpa [#allocation4], 1 }

</bundles_post_ra>
